<compile_context>
chip_gen: v7x
topology: tpu7x:2x2x1
jax: 0.10.0
libtpu: 0.0.40
codegen_flags: <defaults>
</compile_context>

<pallas_src>
import functools

import jax
import jax.numpy as jnp
from jax.experimental import pallas as pl
from jax.experimental.pallas import tpu as pltpu

LN_EPS = 1e-5   # torch.nn.LayerNorm default
LANE = 128      # TPU lane width


def _round_up(x, m):
    return (x + m - 1) // m * m


def _layernorm_masked(h, gamma, beta, width, lane_mask):
    """LayerNorm over the first `width` lanes of a 128-lane-padded tensor.

    Pad lanes of `h` are exactly zero, so the lane-sum equals the true sum;
    the variance masks the pad lanes explicitly (d = -mean there otherwise).
    gamma/beta pad lanes are zero, so the output pad lanes are exactly zero.
    """
    inv_w = 1.0 / float(width)
    mean = jnp.sum(h, axis=-1, keepdims=True) * inv_w
    d = jnp.where(lane_mask, h - mean, 0.0)
    var = jnp.sum(d * d, axis=-1, keepdims=True) * inv_w
    return d * jax.lax.rsqrt(var + LN_EPS) * gamma + beta


def actor_kernel(x_ref, w_ref, v_ref, o_ref, *, fc1, fc2, r_in):
    x = x_ref[...]                                    # (TB, r_in)
    v = v_ref[...]                                    # (8, 128) bias/LN slab

    # Sublane-only, full-lane-width slices of the packed weight slab.
    w1 = w_ref[0:r_in, :]                             # (r_in, 128)
    w2 = w_ref[r_in:r_in + LANE, :]                   # (128, 128)
    w3 = w_ref[r_in + LANE:r_in + 2 * LANE, :]        # (128, 128)

    b1, g1, be1 = v[0:1, :], v[1:2, :], v[2:3, :]
    b2, g2, be2 = v[3:4, :], v[4:5, :], v[5:6, :]
    b3 = v[6:7, :]

    lanes = jax.lax.broadcasted_iota(jnp.int32, (1, LANE), 1)
    m1 = lanes < fc1
    m2 = lanes < fc2

    # fc1 -> LayerNorm -> relu   (pad lanes stay exactly 0)
    h1 = jnp.dot(x, w1, preferred_element_type=jnp.float32) + b1
    h1 = jnp.maximum(_layernorm_masked(h1, g1, be1, fc1, m1), 0.0)

    # fc2 -> LayerNorm -> relu
    h2 = jnp.dot(h1, w2, preferred_element_type=jnp.float32) + b2
    h2 = jnp.maximum(_layernorm_masked(h2, g2, be2, fc2, m2), 0.0)

    # mu -> sigmoid; store either the lane-dense 128-wide tile (tiny B) or
    # the first d_out lanes directly (large B, avoids write amplification).
    z = jax.nn.sigmoid(jnp.dot(h2, w3, preferred_element_type=jnp.float32) + b3)
    o_ref[...] = z[:, :o_ref.shape[-1]]


@functools.partial(jax.jit, static_argnames=("dims",))
def actor_forward(state, wslab, vslab, *, dims):
    d_in, fc1, fc2, d_out = dims
    B = state.shape[0]
    r_in = _round_up(d_in, 8)

    # Feature-pad state to a sublane multiple (no-op for d_in=16).
    if r_in != d_in:
        state = jnp.pad(state, ((0, 0), (0, r_in - d_in)))

    # Batch tiling: single tile for tiny latency-bound batches; for B >= 64
    # split into >= 2 tiles (v7x dual-TC work) capped at 512 rows per tile
    # (trivially within VMEM on v5e/v6e/v7x).  No host-side batch padding:
    # Pallas masks the ragged last block.
    if B >= 64:
        TB = min(512, _round_up(pl.cdiv(B, 2), 8))
    else:
        TB = _round_up(B, 8)
    grid = (pl.cdiv(B, TB),)

    # Output lane width: lane-dense only when latency-bound (tiny B); write
    # d_out directly once the kernel is DMA-bound at larger B.
    out_w = LANE if B < 64 else d_out

    flops = 2 * B * (r_in + 2 * LANE) * LANE
    transcendentals = B * (LANE + 2)                        # sigmoid exps + 2 rsqrt/row
    bytes_accessed = (B * (r_in + out_w) * 4
                      + wslab.size * 4 + vslab.size * 4)

    kernel = functools.partial(actor_kernel, fc1=fc1, fc2=fc2, r_in=r_in)

    out = pl.pallas_call(
        kernel,
        out_shape=jax.ShapeDtypeStruct((B, out_w), jnp.float32),
        grid=grid,
        in_specs=[
            # batch-blocked activations
            pl.BlockSpec((TB, r_in), lambda i: (i, 0)),
            # packed params: constant block index -> resident, DMA'd once
            pl.BlockSpec(wslab.shape, lambda i: (0, 0)),
            pl.BlockSpec(vslab.shape, lambda i: (0, 0)),
        ],
        out_specs=pl.BlockSpec((TB, out_w), lambda i: (i, 0)),
        compiler_params=pltpu.CompilerParams(
            dimension_semantics=("parallel",)),  # 2-TC batch sharding on v7x
        cost_estimate=pl.CostEstimate(
            flops=flops,
            transcendentals=transcendentals,
            bytes_accessed=bytes_accessed),
    )(state, wslab, vslab)

    return out[:, :d_out]


def init_params(key, input_dims, fc1_dims, fc2_dims, n_out):
    """Deterministic synthetic init mirroring the PyTorch module's uniform ranges."""
    k1, k2, k3, k4, k5, k6 = jax.random.split(key, 6)
    f1 = 1.0 / jnp.sqrt(jnp.float32(fc1_dims))   # 1/sqrt(fc1.weight.size()[0])
    f2 = 1.0 / jnp.sqrt(jnp.float32(fc2_dims))   # 1/sqrt(fc2.weight.size()[0])
    f3 = 0.003
    # weights stored as (in, out) == transpose of PyTorch (out, in)
    w1 = jax.random.uniform(k1, (input_dims, fc1_dims), jnp.float32, -f1, f1)
    b1 = jax.random.uniform(k2, (1, fc1_dims), jnp.float32, -f1, f1)
    w2 = jax.random.uniform(k3, (fc1_dims, fc2_dims), jnp.float32, -f2, f2)
    b2 = jax.random.uniform(k4, (1, fc2_dims), jnp.float32, -f2, f2)
    w3 = jax.random.uniform(k5, (fc2_dims, n_out), jnp.float32, -f3, f3)
    b3 = jax.random.uniform(k6, (1, n_out), jnp.float32, -f3, f3)
    # LayerNorm defaults: gamma=1, beta=0
    g1 = jnp.ones((1, fc1_dims), jnp.float32)
    be1 = jnp.zeros((1, fc1_dims), jnp.float32)
    g2 = jnp.ones((1, fc2_dims), jnp.float32)
    be2 = jnp.zeros((1, fc2_dims), jnp.float32)
    return (w1, b1, g1, be1, w2, b2, g2, be2, w3, b3)


def pack_params(params, dims):
    """Pack the 10 param tensors into two full-lane-width VMEM slabs.

    Weight slab rows: [w1: 0..r_in) [w2: r_in..r_in+128) [w3: r_in+128..r_in+256)
    Every weight spans all 128 lanes (zero-padded) so the kernel only slices
    sublanes.  Pad lanes/rows are zero, which keeps LayerNorm/relu pad lanes
    exactly zero (see kernel).
    """
    (w1, b1, g1, be1, w2, b2, g2, be2, w3, b3) = params
    d_in, fc1, fc2, d_out = dims
    assert fc1 <= LANE and fc2 <= LANE and d_out <= LANE
    r_in = _round_up(d_in, 8)
    rows = r_in + 2 * LANE

    wslab = jnp.zeros((rows, LANE), jnp.float32)
    wslab = wslab.at[0:d_in, 0:fc1].set(w1)
    wslab = wslab.at[r_in:r_in + fc1, 0:fc2].set(w2)
    wslab = wslab.at[r_in + LANE:r_in + LANE + fc2, 0:d_out].set(w3)

    vslab = jnp.zeros((8, LANE), jnp.float32)
    vslab = vslab.at[0, 0:fc1].set(b1[0])
    vslab = vslab.at[1, 0:fc1].set(g1[0])
    vslab = vslab.at[2, 0:fc1].set(be1[0])
    vslab = vslab.at[3, 0:fc2].set(b2[0])
    vslab = vslab.at[4, 0:fc2].set(g2[0])
    vslab = vslab.at[5, 0:fc2].set(be2[0])
    vslab = vslab.at[6, 0:d_out].set(b3[0])
    return wslab, vslab


def reference_forward(state, params):
    (w1, b1, g1, be1, w2, b2, g2, be2, w3, b3) = params

    def ln(h, g, b):
        mean = jnp.mean(h, axis=-1, keepdims=True)
        var = jnp.mean((h - mean) ** 2, axis=-1, keepdims=True)
        return (h - mean) * jax.lax.rsqrt(var + LN_EPS) * g + b

    h = jnp.maximum(ln(state @ w1 + b1, g1, be1), 0.0)
    h = jnp.maximum(ln(h @ w2 + b2, g2, be2), 0.0)
    return jax.nn.sigmoid(h @ w3 + b3)


if __name__ == "__main__":
    # Module hyperparams (consistent with the ActorNetwork constructor):
    #   input_dims=8, n_agents=2  -> effective input  = 16
    #   n_actions=4, n_agents=2   -> effective output = 8
    #   fc1_dims=32, fc2_dims=32
    input_dims, n_agents, n_actions = 8, 2, 4
    fc1_dims, fc2_dims = 32, 32
    d_in = input_dims * n_agents
    d_out = n_actions * n_agents
    dims = (d_in, fc1_dims, fc2_dims, d_out)

    key = jax.random.PRNGKey(0)
    k_state, k_params, k_big = jax.random.split(key, 3)
    params = init_params(k_params, d_in, fc1_dims, fc2_dims, d_out)
    wslab, vslab = pack_params(params, dims)

    # Small latency-bound batch (lane-dense output path).
    B = 8
    state = jax.random.normal(k_state, (B, d_in), jnp.float32)
    out = jax.block_until_ready(actor_forward(state, wslab, vslab, dims=dims))
    ref = reference_forward(state, params)
    assert out.shape == (B, d_out)
    assert jnp.allclose(out, ref, atol=1e-5, rtol=1e-5), "small-batch mismatch"

    # Larger DMA-bound batch (multi-step grid, narrow d_out output path).
    B2 = 128
    state2 = jax.random.normal(k_big, (B2, d_in), jnp.float32)
    out2 = jax.block_until_ready(actor_forward(state2, wslab, vslab, dims=dims))
    ref2 = reference_forward(state2, params)
    assert out2.shape == (B2, d_out)
    assert jnp.allclose(out2, ref2, atol=1e-5, rtol=1e-5), "large-batch mismatch"

    # TODO(synk): optimizer / checkpoint save-load from the PyTorch module are
    # host-side utilities with no kernel equivalent and are intentionally omitted.
    print("KERNEL_OK")
</pallas_src>

<mosaic_0001>
module attributes {stable_mosaic.version = 11 : i64} {
  func.func @actor_kernel(%arg0: i32, %arg1: memref<8x16xf32, #tpu.memory_space<vmem>>, %arg2: memref<272x128xf32, #tpu.memory_space<vmem>>, %arg3: memref<8x128xf32, #tpu.memory_space<vmem>>, %arg4: memref<8x128xf32, #tpu.memory_space<vmem>>) attributes {dimension_semantics = [#tpu.dimension_semantics<parallel>], iteration_bounds = array<i64: 1>, scalar_prefetch = 0 : i64, scratch_operands = 0 : i64, tpu.core_type = #tpu.core_type<tc>, window_params = [{transform_indices = @transform_0, window_bounds = array<i64: 8, 16>}, {pipeline_mode = #tpu.pipeline_mode<synchronous>, transform_indices = @transform_1, window_bounds = array<i64: 272, 128>}, {pipeline_mode = #tpu.pipeline_mode<synchronous>, transform_indices = @transform_2, window_bounds = array<i64: 8, 128>}, {transform_indices = @transform_3, window_bounds = array<i64: 8, 128>}]} {
    %c0 = arith.constant 0 : index
    %c0_0 = arith.constant 0 : index
    %0 = vector.load %arg1[%c0, %c0_0] : memref<8x16xf32, #tpu.memory_space<vmem>>, vector<8x16xf32>
    %c0_1 = arith.constant 0 : index
    %c0_2 = arith.constant 0 : index
    %1 = vector.load %arg3[%c0_1, %c0_2] : memref<8x128xf32, #tpu.memory_space<vmem>>, vector<8x128xf32>
    %c0_3 = arith.constant 0 : index
    %c0_4 = arith.constant 0 : index
    %2 = vector.load %arg2[%c0_3, %c0_4] : memref<272x128xf32, #tpu.memory_space<vmem>>, vector<16x128xf32>
    %c16 = arith.constant 16 : index
    %c0_5 = arith.constant 0 : index
    %3 = vector.load %arg2[%c16, %c0_5] : memref<272x128xf32, #tpu.memory_space<vmem>>, vector<128x128xf32>
    %c144 = arith.constant 144 : index
    %c0_6 = arith.constant 0 : index
    %4 = vector.load %arg2[%c144, %c0_6] : memref<272x128xf32, #tpu.memory_space<vmem>>, vector<128x128xf32>
    %5 = vector.extract_strided_slice %1 {offsets = [0, 0], sizes = [1, 128], strides = [1, 1]} : vector<8x128xf32> to vector<1x128xf32>
    %6 = vector.extract_strided_slice %1 {offsets = [1, 0], sizes = [1, 128], strides = [1, 1]} : vector<8x128xf32> to vector<1x128xf32>
    %7 = vector.extract_strided_slice %1 {offsets = [2, 0], sizes = [1, 128], strides = [1, 1]} : vector<8x128xf32> to vector<1x128xf32>
    %8 = vector.extract_strided_slice %1 {offsets = [3, 0], sizes = [1, 128], strides = [1, 1]} : vector<8x128xf32> to vector<1x128xf32>
    %9 = vector.extract_strided_slice %1 {offsets = [4, 0], sizes = [1, 128], strides = [1, 1]} : vector<8x128xf32> to vector<1x128xf32>
    %10 = vector.extract_strided_slice %1 {offsets = [5, 0], sizes = [1, 128], strides = [1, 1]} : vector<8x128xf32> to vector<1x128xf32>
    %11 = vector.extract_strided_slice %1 {offsets = [6, 0], sizes = [1, 128], strides = [1, 1]} : vector<8x128xf32> to vector<1x128xf32>
    %12 = tpu.iota {dimensions = array<i32: 1>} : vector<1x128xi32>
    %c32_i32 = arith.constant 32 : i32
    %13 = vector.broadcast %c32_i32 : i32 to vector<1x128xi32>
    %14 = arith.cmpi slt, %12, %13 : vector<1x128xi32>
    %c32_i32_7 = arith.constant 32 : i32
    %15 = vector.broadcast %c32_i32_7 : i32 to vector<1x128xi32>
    %16 = arith.cmpi slt, %12, %15 : vector<1x128xi32>
    %cst = arith.constant dense<0.000000e+00> : vector<8x128xf32>
    %17 = tpu.matmul %0, %2, %cst {dimension_numbers = #tpu.dot_dimension_numbers<[1], [0], [0], [1], [0, 0, 1, 1], [], []>} : vector<8x16xf32>, vector<16x128xf32>, vector<8x128xf32> -> vector<8x128xf32>
    %18 = vector.broadcast %5 : vector<1x128xf32> to vector<8x128xf32>
    %19 = arith.addf %17, %18 : vector<8x128xf32>
    %cst_8 = arith.constant dense<0.000000e+00> : vector<8xf32>
    %20 = vector.multi_reduction <add>, %19, %cst_8 [1] : vector<8x128xf32> to vector<8xf32>
    %21 = vector.shape_cast %20 : vector<8xf32> to vector<8x1xf32>
    %cst_9 = arith.constant 3.125000e-02 : f32
    %22 = vector.broadcast %cst_9 : f32 to vector<8x1xf32>
    %23 = arith.mulf %21, %22 : vector<8x1xf32>
    %24 = vector.broadcast %23 : vector<8x1xf32> to vector<8x128xf32>
    %25 = arith.subf %19, %24 : vector<8x128xf32>
    %cst_10 = arith.constant 0.000000e+00 : f32
    %26 = vector.shape_cast %14 : vector<1x128xi1> to vector<1x128xi1>
    %27 = vector.broadcast %26 : vector<1x128xi1> to vector<8x128xi1>
    %28 = vector.broadcast %cst_10 : f32 to vector<8x128xf32>
    %29 = arith.select %27, %25, %28 : vector<8x128xi1>, vector<8x128xf32>
    %30 = arith.mulf %29, %29 : vector<8x128xf32>
    %cst_11 = arith.constant dense<0.000000e+00> : vector<8xf32>
    %31 = vector.multi_reduction <add>, %30, %cst_11 [1] : vector<8x128xf32> to vector<8xf32>
    %32 = vector.shape_cast %31 : vector<8xf32> to vector<8x1xf32>
    %cst_12 = arith.constant 3.125000e-02 : f32
    %33 = vector.broadcast %cst_12 : f32 to vector<8x1xf32>
    %34 = arith.mulf %32, %33 : vector<8x1xf32>
    %cst_13 = arith.constant 9.99999974E-6 : f32
    %35 = vector.broadcast %cst_13 : f32 to vector<8x1xf32>
    %36 = arith.addf %34, %35 : vector<8x1xf32>
    %37 = math.rsqrt %36 : vector<8x1xf32>
    %38 = vector.broadcast %37 : vector<8x1xf32> to vector<8x128xf32>
    %39 = arith.mulf %29, %38 : vector<8x128xf32>
    %40 = vector.broadcast %6 : vector<1x128xf32> to vector<8x128xf32>
    %41 = arith.mulf %39, %40 : vector<8x128xf32>
    %42 = vector.broadcast %7 : vector<1x128xf32> to vector<8x128xf32>
    %43 = arith.addf %41, %42 : vector<8x128xf32>
    %cst_14 = arith.constant 0.000000e+00 : f32
    %44 = vector.broadcast %cst_14 : f32 to vector<8x128xf32>
    %45 = arith.maximumf %43, %44 : vector<8x128xf32>
    %cst_15 = arith.constant dense<0.000000e+00> : vector<8x128xf32>
    %46 = tpu.matmul %45, %3, %cst_15 {dimension_numbers = #tpu.dot_dimension_numbers<[1], [0], [0], [1], [0, 0, 1, 1], [], []>} : vector<8x128xf32>, vector<128x128xf32>, vector<8x128xf32> -> vector<8x128xf32>
    %47 = vector.broadcast %8 : vector<1x128xf32> to vector<8x128xf32>
    %48 = arith.addf %46, %47 : vector<8x128xf32>
    %cst_16 = arith.constant dense<0.000000e+00> : vector<8xf32>
    %49 = vector.multi_reduction <add>, %48, %cst_16 [1] : vector<8x128xf32> to vector<8xf32>
    %50 = vector.shape_cast %49 : vector<8xf32> to vector<8x1xf32>
    %cst_17 = arith.constant 3.125000e-02 : f32
    %51 = vector.broadcast %cst_17 : f32 to vector<8x1xf32>
    %52 = arith.mulf %50, %51 : vector<8x1xf32>
    %53 = vector.broadcast %52 : vector<8x1xf32> to vector<8x128xf32>
    %54 = arith.subf %48, %53 : vector<8x128xf32>
    %cst_18 = arith.constant 0.000000e+00 : f32
    %55 = vector.shape_cast %16 : vector<1x128xi1> to vector<1x128xi1>
    %56 = vector.broadcast %55 : vector<1x128xi1> to vector<8x128xi1>
    %57 = vector.broadcast %cst_18 : f32 to vector<8x128xf32>
    %58 = arith.select %56, %54, %57 : vector<8x128xi1>, vector<8x128xf32>
    %59 = arith.mulf %58, %58 : vector<8x128xf32>
    %cst_19 = arith.constant dense<0.000000e+00> : vector<8xf32>
    %60 = vector.multi_reduction <add>, %59, %cst_19 [1] : vector<8x128xf32> to vector<8xf32>
    %61 = vector.shape_cast %60 : vector<8xf32> to vector<8x1xf32>
    %cst_20 = arith.constant 3.125000e-02 : f32
    %62 = vector.broadcast %cst_20 : f32 to vector<8x1xf32>
    %63 = arith.mulf %61, %62 : vector<8x1xf32>
    %cst_21 = arith.constant 9.99999974E-6 : f32
    %64 = vector.broadcast %cst_21 : f32 to vector<8x1xf32>
    %65 = arith.addf %63, %64 : vector<8x1xf32>
    %66 = math.rsqrt %65 : vector<8x1xf32>
    %67 = vector.broadcast %66 : vector<8x1xf32> to vector<8x128xf32>
    %68 = arith.mulf %58, %67 : vector<8x128xf32>
    %69 = vector.broadcast %9 : vector<1x128xf32> to vector<8x128xf32>
    %70 = arith.mulf %68, %69 : vector<8x128xf32>
    %71 = vector.broadcast %10 : vector<1x128xf32> to vector<8x128xf32>
    %72 = arith.addf %70, %71 : vector<8x128xf32>
    %cst_22 = arith.constant 0.000000e+00 : f32
    %73 = vector.broadcast %cst_22 : f32 to vector<8x128xf32>
    %74 = arith.maximumf %72, %73 : vector<8x128xf32>
    %cst_23 = arith.constant dense<0.000000e+00> : vector<8x128xf32>
    %75 = tpu.matmul %74, %4, %cst_23 {dimension_numbers = #tpu.dot_dimension_numbers<[1], [0], [0], [1], [0, 0, 1, 1], [], []>} : vector<8x128xf32>, vector<128x128xf32>, vector<8x128xf32> -> vector<8x128xf32>
    %76 = vector.broadcast %11 : vector<1x128xf32> to vector<8x128xf32>
    %77 = arith.addf %75, %76 : vector<8x128xf32>
    %78 = arith.negf %77 : vector<8x128xf32>
    %79 = math.exp %78 : vector<8x128xf32>
    %cst_24 = arith.constant 1.000000e+00 : f32
    %80 = vector.broadcast %cst_24 : f32 to vector<8x128xf32>
    %81 = arith.addf %80, %79 : vector<8x128xf32>
    %82 = arith.divf %80, %81 : vector<8x128xf32>
    %c0_25 = arith.constant 0 : index
    %c0_26 = arith.constant 0 : index
    %83 = vector.load %arg4[%c0_25, %c0_26] : memref<8x128xf32, #tpu.memory_space<vmem>>, vector<8x128xf32>
    tpu.vector_store %arg4[%c0_25, %c0_26], %82 {strides = array<i32>} : memref<8x128xf32, #tpu.memory_space<vmem>>, vector<8x128xf32>,
    return
  }
  func.func @transform_0(%arg0: i32) -> (i32, i32) {
    %c0_i32 = arith.constant 0 : i32
    %c0_i32_0 = arith.constant 0 : i32
    return %arg0, %c0_i32 : i32, i32
  }
  func.func @transform_1(%arg0: i32) -> (i32, i32) {
    %c0_i32 = arith.constant 0 : i32
    %c0_i32_0 = arith.constant 0 : i32
    %c0_i32_1 = arith.constant 0 : i32
    return %c0_i32, %c0_i32_0 : i32, i32
  }
  func.func @transform_2(%arg0: i32) -> (i32, i32) {
    %c0_i32 = arith.constant 0 : i32
    %c0_i32_0 = arith.constant 0 : i32
    %c0_i32_1 = arith.constant 0 : i32
    return %c0_i32, %c0_i32_0 : i32, i32
  }
  func.func @transform_3(%arg0: i32) -> (i32, i32) {
    %c0_i32 = arith.constant 0 : i32
    %c0_i32_0 = arith.constant 0 : i32
    return %arg0, %c0_i32 : i32, i32
  }
}

</mosaic_0001>

<bundles_post_ra>
// kernel: actor_forward.1
= control target key start
LH: loop header
LB: loop body
LE: loop exit
PB: predicated region body
PF: predicated region fallthrough
CT: control target
= control target key end

     0   :  { %8 = vsyncpa [#allocation3], 0  ;;  %s785_s0 = inlined_call_operand.hbm [shape: f32[8,16], index: 0, kind: input, shape index: {}]   ;;  %s786_s1 = inlined_call_operand.hbm [shape: f32[272,128], index: 1, kind: input, shape index: {}]   ;;  %s787_s2 = inlined_call_operand.hbm [shape: f32[8,128], index: 2, kind: input, shape index: {}]   ;;  %s788_s3 = inlined_call_operand.hbm [shape: f32[8,128], index: 3, kind: output, shape index: {}]  }
   0x1   :  { %9 = vsyncpa [#allocation6], 0 }
   0x2   :  { %10 = vsyncpa [#allocation4], 0  ;;  %s666_s12 = smov [#allocation5]   ;;  %s572_s16 = scalar_lea.hbm %s786_s1, 4352 }
   0x3   :  { %s26_s13 = sshll.u32 %s666_s12, 4  ;;  %p573_p0 = scmp.ne.s32.totalorder %s786_s1, %s572_s16  ;;  %s27_s13 = int_to_ptr.vmem [resolvable:$true] %s26_s13 }
   0x4   :  { %p576_p1 = scmp.lt.u32.totalorder %s572_s16, %s786_s1 }
   0x6   :  { %p578_p2 = pnand %p576_p1, %p573_p0 }
   0x8   :  { %581 = shalt.err (!%p578_p2)
}
   0x9   :  { %s582_s21 = scalar_lea.vmem %s27_s13, 4352  ;;  %p587_p4 = scmp.lt.s32.totalorder %s27_s13, %s27_s13 }
   0xa   :  { %p583_p3 = scmp.ne.s32.totalorder %s27_s13, %s582_s21  ;;  %p588_p5 = scmp.lt.s32.totalorder %s582_s21, %s582_s21 }
   0xc   :  { %p589_p6 = por %p588_p5, %p587_p4 }
   0xe   :  { %p590_p7 = pnand %p589_p6, %p583_p3 }
  0x10   :  { %593 = shalt.err (!%p590_p7)
}
  0x11   :  { %s667_s22 = smov 128   ;;  %s668_s23 = smov 8  }
  0x12   :  { %32 = dma.hbm_to_vmem [thread:$0]  %s786_s1, 4352, %s27_s13, [#allocation6], %s667_s22, %s667_s22, %s668_s23  }
  0x13   :  { %s669_s26 = smov [#allocation2]   ;;  %s670_s28 = smov [#allocation7]  }
  0x14   :  { %s17_s27 = sshll.u32 %s669_s26, 4  ;;  %s39_s29 = sshll.u32 %s670_s28, 4  ;;  %s18_s27 = int_to_ptr.vmem [resolvable:$true] %s17_s27  ;;  %s40_s29 = int_to_ptr.vmem [resolvable:$true] %s39_s29 }
  0x15   :  { %s594_s5 = scalar_lea.hbm %s785_s0, 128 }
  0x16   :  { %p595_p8 = scmp.ne.s32.totalorder %s785_s0, %s594_s5  ;;  %p598_p9 = scmp.lt.u32.totalorder %s594_s5, %s785_s0 }
  0x18   :  { %p600_p10 = pnand %p598_p9, %p595_p8 }
  0x1a   :  { %603 = shalt.err (!%p600_p10)
}
  0x1b   :  { %s604_s1 = scalar_lea.vmem %s18_s27, 128  ;;  %p609_p12 = scmp.lt.s32.totalorder %s18_s27, %s18_s27 }
  0x1c   :  { %p605_p11 = scmp.ne.s32.totalorder %s18_s27, %s604_s1  ;;  %p610_p13 = scmp.lt.s32.totalorder %s604_s1, %s604_s1 }
  0x1e   :  { %p611_p0 = por %p610_p13, %p609_p12 }
  0x20   :  { %p612_p1 = pnand %p611_p0, %p605_p11 }
  0x22   :  { %615 = shalt.err (!%p612_p1)
}
  0x23   :  { %20 = dma.hbm_to_vmem [thread:$0]  %s785_s0, 128, %s18_s27, [#allocation3]  }
  0x24   :  { %s616_s14 = scalar_lea.hbm %s787_s2, 128 }
  0x25   :  { %p617_p2 = scmp.ne.s32.totalorder %s787_s2, %s616_s14  ;;  %p620_p3 = scmp.lt.u32.totalorder %s616_s14, %s787_s2 }
  0x27   :  { %p622_p4 = pnand %p620_p3, %p617_p2 }
  0x29   :  { %625 = shalt.err (!%p622_p4)
}
  0x2a   :  { %s626_s19 = scalar_lea.vmem %s40_s29, 128  ;;  %p631_p6 = scmp.lt.s32.totalorder %s40_s29, %s40_s29 }
  0x2b   :  { %p627_p5 = scmp.ne.s32.totalorder %s40_s29, %s626_s19  ;;  %p632_p7 = scmp.lt.s32.totalorder %s626_s19, %s626_s19 }
  0x2d   :  { %p633_p8 = por %p632_p7, %p631_p6 }
  0x2f   :  { %p634_p9 = pnand %p633_p8, %p627_p5 }
  0x31   :  { %637 = shalt.err (!%p634_p9)
}
  0x32   :  { %42 = dma.hbm_to_vmem [thread:$0]  %s787_s2, 128, %s40_s29, [#allocation6]  }
  0x33   :  { %660 = dma.done.wait [#allocation3], 128  }
  0x34   :  { %661 = vsyncadd [#allocation3], 4294967168 }
  0x35   :  { %662 = dma.done.wait [#allocation6], 4480  }
  0x36   :  { %663 = vsyncadd [#allocation6], 4294962816  ;;  %v671_v0 = vmov 0.0|0.0   ;;  %vm672_vm0 = vmmov 0   ;;  %v673_v1 = vmov 0.0   ;;  %v54_v2 = vld [vmem:[#allocation5] sm:$0xff]  ;;  %v88_v6 = vlaneseq }
  0x37   :  { %504 = vmatprep.subr.bf16.mxu0 %v671_v0  ;;  %431 = vmatprep.mubr.msk.f32.mxu0 %vm672_vm0, %v673_v1  ;;  %v55_v3 = vld [vmem:[#allocation5 + $0x8] sm:$0xff]  ;;  %v52_v5 = vld [vmem:[#allocation2] sm:$0xff]  ;;  %vm95_vm1 = vcmask 130048   ;;  %v737_v9 = vld [vmem:[#allocation7] sm:$0xff]  ;;  %s674_s2 = smov [#allocation8]  }
  0x38   :  { %507 = vmatprep.subr.bf16.mxu1 %v671_v0  ;;  %466 = vmatprep.mubr.msk.f32.mxu1 %vm672_vm0, %v673_v1  ;;  %v505_v4 = vpack.c.bf16 %v55_v3, %v54_v2  ;;  %v734_v7 = vshrl.u32 %v88_v6, 7  ;;  %v56_v14 = vld [vmem:[#allocation5 + $0x10] sm:$0xff]  ;;  %v57_v15 = vld [vmem:[#allocation5 + $0x18] sm:$0xff]  ;;  %v58_v16 = vld [vmem:[#allocation5 + $0x20] sm:$0xff]  ;;  %v742_v20 = vand.u32 127, %v88_v6  ;;  %s378_s21 = sshll.u32 %s674_s2, 4  ;;  %s379_s21 = int_to_ptr.vmem [resolvable:$true] %s378_s21 }
  0x39   :  { %v508_v17 = vpack.c.bf16 %v57_v15, %v56_v14  ;;  %v59_v18 = vld [vmem:[#allocation5 + $0x28] sm:$0xff]  ;;  %v60_v26 = vld [vmem:[#allocation5 + $0x30] sm:$0xff]  ;;  %v61_v27 = vld [vmem:[#allocation5 + $0x38] sm:$0xff]  ;;  %s638_s22 = scalar_lea.vmem %s379_s21, 128  ;;  %p643_p11 = scmp.lt.s32.totalorder %s379_s21, %s379_s21 }
  0x3a   :  { %506 = vmatpush3.bf16.msra.mxu0 %v505_v4  ;;  %v93_v8 = vsub.s32 0, %v734_v7  ;;  %v511_v19 = vpack.c.bf16 %v59_v18, %v58_v16  ;;  %vm90_vm2 = vcmp.lt.s32.totalorder %v742_v20, 32  ;;  %v514_v28 = vpack.c.bf16 %v61_v27, %v60_v26  ;;  %v62_v29 = vld [vmem:[#allocation5 + $0x40] sm:$0xff]  ;;  %v63_v30 = vld [vmem:[#allocation5 + $0x48] sm:$0xff]  ;;  %v64_v32 = vld [vmem:[#allocation5 + $0x50] sm:$0xff]  ;;  %p639_p10 = scmp.ne.s32.totalorder %s379_s21, %s638_s22  ;;  %p644_p12 = scmp.lt.s32.totalorder %s638_s22, %s638_s22 }
  0x3b   :  { %531 = vmatprep.subr.bf16.mxu0 %v671_v0  ;;  %509 = vmatpush3.bf16.msra.mxu1 %v508_v17  ;;  %v517_v31 = vpack.c.bf16 %v63_v30, %v62_v29  ;;  %v65_v33 = vld [vmem:[#allocation5 + $0x58] sm:$0xff]  ;;  %v66_v35 = vld [vmem:[#allocation5 + $0x60] sm:$0xff]  ;;  %v67_v36 = vld [vmem:[#allocation5 + $0x68] sm:$0xff]  ;;  %v185_v47 = vsub.s32 1, %v734_v7  ;;  %v190_v48 = vsub.s32 2, %v734_v7  ;;  %v196_v56 = vsub.s32 3, %v734_v7 }
  0x3c   :  { %v94_v10 = vrot.slane %v737_v9, %v93_v8  ;;  %510 = vmatprep.subr.bf16.mxu1 %v671_v0  ;;  %v520_v34 = vpack.c.bf16 %v65_v33, %v64_v32  ;;  %v523_v37 = vpack.c.bf16 %v67_v36, %v66_v35  ;;  %v68_v38 = vld [vmem:[#allocation5 + $0x70] sm:$0xff]  ;;  %v69_v39 = vld [vmem:[#allocation5 + $0x78] sm:$0xff]  ;;  %v70_v41 = vld [vmem:[#allocation5 + $0x80] sm:$0xff]  ;;  %v282_v32 = vsub.s32 4, %v734_v7  ;;  %p645_p13 = por %p644_p12, %p643_p11 }
  0x3d   :  { %432 = vmatmul.mubr.msk.f32.vlgmr.msra.gmra.mrb[0].mxu0 %vm95_vm1, %v52_v5  ;;  %v526_v40 = vpack.c.bf16 %v69_v39, %v68_v38  ;;  %v71_v42 = vld [vmem:[#allocation5 + $0x88] sm:$0xff]  ;;  %v186_v49 = vrot.slane %v737_v9, %v185_v47  ;;  %v191_v52 = vrot.slane %v737_v9, %v190_v48  ;;  %v197_v57 = vrot.slane %v737_v9, %v196_v56  ;;  %v72_v61 = vld [vmem:[#allocation5 + $0x90] sm:$0xff]  ;;  %v73_v62 = vld [vmem:[#allocation5 + $0x98] sm:$0xff] }
  0x3e   :  { %501 = vmatprep.mubr.msk.f32.mxu0 %vm672_vm0, %v673_v1  ;;  %v529_v43 = vpack.c.bf16 %v71_v42, %v70_v41  ;;  %v74_v63 = vld [vmem:[#allocation5 + $0xa0] sm:$0xff]  ;;  %v532_v1 = vpack.c.bf16 %v73_v62, %v72_v61  ;;  %v75_v2 = vld [vmem:[#allocation5 + $0xa8] sm:$0xff]  ;;  %v80_v17 = vld [vmem:[#allocation5 + $0xd0] sm:$0xff]  ;;  %v287_v33 = vsub.s32 5, %v734_v7  ;;  %p646_p0 = pnand %p645_p13, %p639_p10 }
  0x3f   :  { %512 = vmatpush3.bf16.msra.mxu1 %v511_v19  ;;  %v535_v3 = vpack.c.bf16 %v75_v2, %v74_v63  ;;  %v78_v14 = vld [vmem:[#allocation5 + $0xc0] sm:$0xff]  ;;  %v79_v15 = vld [vmem:[#allocation5 + $0xc8] sm:$0xff]  ;;  %v81_v18 = vld [vmem:[#allocation5 + $0xd8] sm:$0xff] }
  0x40   :  { %513 = vmatprep.subr.bf16.mxu1 %v671_v0  ;;  %533 = vmatpush3.bf16.msra.mxu0 %v532_v1  ;;  %v541_v16 = vpack.c.bf16 %v79_v15, %v78_v14  ;;  %v544_v19 = vpack.c.bf16 %v81_v18, %v80_v17  ;;  %v82_v20 = vld [vmem:[#allocation5 + $0xe0] sm:$0xff]  ;;  %v87_v27 = vld [vmem:[#allocation5 + $0x108] sm:$0xff] }
  0x41   :  { %534 = vmatprep.subr.bf16.mxu0 %v671_v0  ;;  %v86_v26 = vld [vmem:[#allocation5 + $0x100] sm:$0xff] }
  0x43   :  { %515 = vmatpush3.bf16.msra.mxu1 %v514_v28  ;;  %v553_v28 = vpack.c.bf16 %v87_v27, %v86_v26 }
  0x44   :  { %516 = vmatprep.subr.bf16.mxu1 %v671_v0  ;;  %536 = vmatpush3.bf16.msra.mxu0 %v535_v3 }
  0x45   :  { %537 = vmatprep.subr.bf16.mxu0 %v671_v0 }
  0x47   :  { %518 = vmatpush3.bf16.msra.mxu1 %v517_v31 }
  0x48   :  { %519 = vmatprep.subr.bf16.mxu1 %v671_v0 }
  0x4b   :  { %521 = vmatpush3.bf16.msra.mxu1 %v520_v34  ;;  %v283_v34 = vrot.slane %v737_v9, %v282_v32 }
  0x4c   :  { %522 = vmatprep.subr.bf16.mxu1 %v671_v0 }
  0x4f   :  { %524 = vmatpush3.bf16.msra.mxu1 %v523_v37  ;;  %v288_v37 = vrot.slane %v737_v9, %v287_v33 }
  0x50   :  { %525 = vmatprep.subr.bf16.mxu1 %v671_v0 }
  0x53   :  { %527 = vmatpush3.bf16.msra.mxu1 %v526_v40 }
  0x54   :  { %528 = vmatprep.subr.bf16.mxu1 %v671_v0 }
  0x57   :  { %530 = vmatpush3.bf16.msra.mxu1 %v529_v43 }
 0x110   :  { %v165_v11 = vpop.f32.mrb[0].mxu0 }
 0x111   :  { %v166_v12 = vadd.f32 %v165_v11, %v94_v10  ;;  %v433_v13 = vpop.f32.mrb[1].mxu0  ;;  %v76_v11 = vld [vmem:[#allocation5 + $0xb0] sm:$0xff] }
 0x113   :  { %169 = vadd.xlane.f32.xlu0 %v166_v12 }
 0x1a0   :  { %v170_v21 = vpop.xlane.xlu0 %169 }
 0x1a1   :  { %v171_v22 = vmul.f32 0.03125, %v170_v21  ;;  %v83_v21 = vld [vmem:[#allocation5 + $0xe8] sm:$0xff] }
 0x1a3   :  { %v172_v23 = vsub.f32 %v166_v12, %v171_v22  ;;  %v77_v12 = vld [vmem:[#allocation5 + $0xb8] sm:$0xff]  ;;  %v547_v22 = vpack.c.bf16 %v83_v21, %v82_v20 }
 0x1a4   :  { %v538_v13 = vpack.c.bf16 %v77_v12, %v76_v11 }
 0x1a5   :  { %v175_v24 = vsel %vm90_vm2, %v172_v23, 0.0  ;;  %v84_v23 = vld [vmem:[#allocation5 + $0xf0] sm:$0xff] }
 0x1a6   :  { %v176_v25 = vmul.f32 %v175_v24, %v175_v24  ;;  %539 = vmatpush3.bf16.msra.mxu0 %v538_v13 }
 0x1a7   :  { %540 = vmatprep.subr.bf16.mxu0 %v671_v0 }
 0x1a8   :  { %177 = vadd.xlane.f32.xlu0 %v176_v25 }
 0x1aa   :  { %542 = vmatpush3.bf16.msra.mxu0 %v541_v16 }
 0x1ab   :  { %543 = vmatprep.subr.bf16.mxu0 %v671_v0 }
 0x1ae   :  { %545 = vmatpush3.bf16.msra.mxu0 %v544_v19 }
 0x1af   :  { %546 = vmatprep.subr.bf16.mxu0 %v671_v0 }
 0x1b2   :  { %548 = vmatpush3.bf16.msra.mxu0 %v547_v22 }
 0x1b3   :  { %549 = vmatprep.subr.bf16.mxu0 %v671_v0 }
 0x235   :  { %v178_v44 = vpop.xlane.xlu0 %177 }
 0x236   :  { %v179_v45 = vmul.f32 0.03125, %v178_v44 }
 0x238   :  { %v180_v46 = vadd.f32 1e-05, %v179_v45 }
 0x23a   :  { %564 = vrsqrt.f32 %v180_v46 }
 0x244   :  { %v565_v50 = vpop.eup %564 }
 0x245   :  { %v182_v51 = vmul.f32 %v565_v50, %v175_v24  ;;  %v85_v24 = vld [vmem:[#allocation5 + $0xf8] sm:$0xff] }
 0x246   :  { %v550_v25 = vpack.c.bf16 %v85_v24, %v84_v23 }
 0x247   :  { %v187_v53 = vmul.f32 %v186_v49, %v182_v51 }
 0x248   :  { %551 = vmatpush3.bf16.msra.mxu0 %v550_v25 }
 0x249   :  { %v192_v54 = vadd.f32 %v191_v52, %v187_v53  ;;  %552 = vmatprep.subr.bf16.mxu0 %v671_v0  ;;  %v293_v0 = vsub.s32 6, %v734_v7 }
 0x24b   :  { %v193_v55 = vmax.f32 %v192_v54, 0.0  ;;  %v294_v41 = vrot.slane %v737_v9, %v293_v0 }
 0x24c   :  { %554 = vmatpush3.bf16.msra.mxu0 %v553_v28 }
 0x24d   :  { %467 = vmatmul.mubr.f32.vlgmr.msra.gmra.mrb[0].mxu1 %v193_v55 }
 0x320   :  { %v264_v58 = vpop.f32.mrb[0].mxu1 }
 0x321   :  { %v265_v59 = vadd.f32 %v264_v58, %v197_v57  ;;  %v468_v60 = vpop.f32.mrb[1].mxu1 }
 0x323   :  { %268 = vadd.xlane.f32.xlu1 %v265_v59 }
 0x3b0   :  { %v269_v4 = vpop.xlane.xlu1 %268 }
 0x3b1   :  { %v270_v5 = vmul.f32 0.03125, %v269_v4 }
 0x3b3   :  { %v271_v6 = vsub.f32 %v265_v59, %v270_v5 }
 0x3b5   :  { %v272_v8 = vsel %vm90_vm2, %v271_v6, 0.0 }
 0x3b6   :  { %v273_v10 = vmul.f32 %v272_v8, %v272_v8 }
 0x3b8   :  { %274 = vadd.xlane.f32.xlu1 %v273_v10 }
 0x445   :  { %v275_v29 = vpop.xlane.xlu1 %274 }
 0x446   :  { %v276_v30 = vmul.f32 0.03125, %v275_v29 }
 0x448   :  { %v277_v31 = vadd.f32 1e-05, %v276_v30 }
 0x44a   :  { %566 = vrsqrt.f32 %v277_v31 }
 0x454   :  { %v567_v35 = vpop.eup %566 }
 0x455   :  { %v279_v36 = vmul.f32 %v567_v35, %v272_v8 }
 0x457   :  { %v284_v38 = vmul.f32 %v283_v34, %v279_v36 }
 0x459   :  { %v289_v39 = vadd.f32 %v288_v37, %v284_v38 }
 0x45b   :  { %v290_v40 = vmax.f32 %v289_v39, 0.0 }
 0x45d   :  { %502 = vmatmul.mubr.f32.vlgmr.msra.gmra.mrb[2].mxu0 %v290_v40 }
 0x530   :  { %v361_v42 = vpop.f32.mrb[2].mxu0 }
 0x531   :  { %v362_v43 = vadd.f32 %v361_v42, %v294_v41  ;;  %v503_v44 = vpop.f32.mrb[3].mxu0 }
 0x533   :  { %v389_v45 = vmul.f32 -1.442695, %v362_v43 }
 0x535   :  { %568 = vpow2.f32 %v389_v45 }
 0x53f   :  { %v569_v46 = vpop.eup %568 }
 0x540   :  { %v368_v47 = vadd.f32 1.0, %v569_v46 }
 0x542   :  { %570 = vrcp.f32 %v368_v47 }
 0x54c   :  { %v571_v48 = vpop.eup %570 }
 0x54d   :  { %371 = vst [vmem:[#allocation8] sm:$0xff] %v571_v48 }
 0x54e   :  { %649 = shalt.err (!%p646_p0)
}
 0x54f   :  { %s650_s25 = scalar_lea.hbm %s788_s3, 128 }
 0x550   :  { %p651_p1 = scmp.ne.s32.totalorder %s788_s3, %s650_s25  ;;  %p654_p2 = scmp.lt.u32.totalorder %s650_s25, %s788_s3 }
 0x552   :  { %p656_p3 = pnand %p654_p2, %p651_p1 }
 0x554   :  { %659 = shalt.err (!%p656_p3)
}
 0x555   :  { %381 = dma.vmem_to_hbm [thread:$0]  %s379_s21, 128, %s788_s3, [#allocation4]  }
 0x556   :  { %664 = dma.done.wait [#allocation4], 128  }
 0x557   :  { %665 = vsyncadd [#allocation4], 4294967168 }
 0x558   :  { %385 = vsyncpa [#allocation3], 1 }
 0x559   :  { %386 = vsyncpa [#allocation6], 1 }
 0x55a   :  { %387 = vsyncpa [#allocation4], 1 }

</bundles_post_ra>
